<compile_context>
chip_gen: v6e
topology: v6e:2x2x1
jax: 0.10.0
libtpu: 0.0.40
codegen_flags: <defaults>
</compile_context>

<pallas_src>
import functools

import jax
import jax.numpy as jnp
from jax.experimental import pallas as pl
from jax.experimental.pallas import tpu as pltpu

LANE = 128             # TPU lane width
DEFAULT_TILE_B = 2048  # batch rows per grid step (d is small -> big tiles amortize
                       # the ~0.35us/step grid overhead; VMEM use is still tiny)


def _round_up(x, m):
    return ((x + m - 1) // m) * m


def project_simplex(v):
    """Euclidean projection of each row of v onto the probability simplex.

    Mirrors the project_simplex applied to lin2.weight in CommittorNet.__init__.
    Init-time-only plain-JAX glue (not part of the hot path).
    """
    n = v.shape[-1]
    u = jnp.sort(v, axis=-1)[..., ::-1]
    css = jnp.cumsum(u, axis=-1)
    k = jnp.arange(1, n + 1, dtype=v.dtype)
    cond = u - (css - 1.0) / k > 0
    rho = jnp.sum(cond, axis=-1, keepdims=True)
    theta = (jnp.take_along_axis(css, rho - 1, axis=-1) - 1.0) / rho.astype(v.dtype)
    return jnp.maximum(v - theta, 0.0)


def committor_kernel(x_ref, w1_ref, b1_ref, w2_ref, o_ref, *, mxu_dtype):
    """One batch tile: cast (VPU) -> lin1 (MXU, f32 acc) -> +bias (VPU) -> sigmoid (EUP)
    -> lin2 as VPU multiply + XLU lane reduce, stored lane-dense (1, TB)."""
    # In-kernel cast of the streamed input to the MXU operand dtype: HBM sees x only
    # once (in its native dtype); the cast rides a spare VALU slot.
    x = x_ref[...].astype(mxu_dtype)
    # lin1: (TB, d) @ (d, Npad) on the MXU; f32 accumulation even for bf16 operands.
    h = jnp.dot(x, w1_ref[...], preferred_element_type=jnp.float32)
    h = h + b1_ref[...]          # (1, Npad) bias broadcast — free VALU slot
    h = jax.nn.sigmoid(h)        # EUP transcendental, kept in f32
    # lin2 (num_nodes -> 1, no bias): multiply + lane reduction instead of an
    # N=1 MXU matmul (which would waste 255/256 of the MXU result tile).
    red = jnp.sum(h * w2_ref[...], axis=-1)     # (TB,)
    o_ref[...] = jnp.reshape(red, (1, -1))      # lane-dense (1, TB) store


@functools.partial(jax.jit, static_argnames=("tile_b", "mxu_dtype"))
def committor_net(x, w1, b1, w2, *, tile_b=DEFAULT_TILE_B, mxu_dtype=jnp.bfloat16):
    """Forward pass of CommittorNet.

    x:  [B, d] float32
    w1: [num_nodes, d]   (PyTorch lin1.weight)
    b1: [num_nodes]      (PyTorch lin1.bias)
    w2: [1, num_nodes]   (PyTorch lin2.weight, simplex-projected)
    returns [B, 1] float32
    """
    B, d = x.shape
    num_nodes = w1.shape[0]

    # ---- layout prep (tiny, VMEM-resident tensors) ----------------------------
    # Zero-pad num_nodes to a full 128-lane vreg. Zero weight columns + zero bias
    # give sigmoid(0)=0.5 in the hidden layer, but the matching zero in w2 makes
    # their contribution exactly 0 -> results are bit-identical.
    n_pad = _round_up(num_nodes, LANE)
    w1_t = (jnp.zeros((d, n_pad), jnp.float32).at[:, :num_nodes].set(w1.T)
            .astype(mxu_dtype))                       # tiny & resident: cast host-side
    b1_row = jnp.zeros((1, n_pad), jnp.float32).at[:, :num_nodes].set(b1.reshape(1, -1))
    w2_row = jnp.zeros((1, n_pad), jnp.float32).at[:, :num_nodes].set(w2.reshape(1, -1))

    # ---- batch tiling ----------------------------------------------------------
    if B > tile_b:
        tb = tile_b                      # multiple of 8/16/128
        b_pad = _round_up(B, tb)
    else:
        b_pad = _round_up(B, 16)         # single tile; 16 keeps bf16 sublanes happy
        tb = b_pad
    num_tiles = b_pad // tb

    x_p = x
    if b_pad != B:
        x_p = jnp.zeros((b_pad, d), x.dtype).at[:B, :].set(x)

    cost = pl.CostEstimate(
        flops=2 * b_pad * d * n_pad + 3 * b_pad * n_pad,
        transcendentals=b_pad * n_pad,            # sigmoid
        bytes_accessed=(x_p.size * x_p.dtype.itemsize
                        + w1_t.size * w1_t.dtype.itemsize
                        + b1_row.size * 4 + w2_row.size * 4
                        + b_pad * 4),
    )

    kernel = functools.partial(committor_kernel, mxu_dtype=mxu_dtype)

    out = pl.pallas_call(
        kernel,
        out_shape=jax.ShapeDtypeStruct((1, b_pad), jnp.float32),  # lane-dense slab
        grid_spec=pltpu.PrefetchScalarGridSpec(
            num_scalar_prefetch=0,
            grid=(num_tiles,),
            in_specs=[
                pl.BlockSpec((tb, d), lambda i: (i, 0)),      # streamed per batch tile
                pl.BlockSpec((d, n_pad), lambda i: (0, 0)),   # VMEM-resident weights
                pl.BlockSpec((1, n_pad), lambda i: (0, 0)),   # bias
                pl.BlockSpec((1, n_pad), lambda i: (0, 0)),   # lin2 weight row
            ],
            out_specs=pl.BlockSpec((1, tb), lambda i: (0, i)),
        ),
        compiler_params=pltpu.CompilerParams(
            # independent batch tiles -> shard across both TensorCores on v7x
            dimension_semantics=("parallel",),
            # explicit scoped-VMEM limit: safe on v5e/v6e (128 MiB) and v7x (64 MiB)
            vmem_limit_bytes=32 * 1024 * 1024,
        ),
        cost_estimate=cost,
    )(x_p, w1_t, b1_row, w2_row)

    # (1, B_pad) -> (B, 1), dropping padded rows.
    return out.reshape(b_pad, 1)[:B, :]


if __name__ == "__main__":
    # Small shapes consistent with CommittorNet(d, num_nodes)
    B, d, num_nodes = 8, 16, 32

    key = jax.random.PRNGKey(0)
    kx, kw1, kb1, kw2 = jax.random.split(key, 4)

    x = jax.random.normal(kx, (B, d), dtype=jnp.float32)

    # lin1: nn.Linear(d, num_nodes, bias=True) -> weight [num_nodes, d], bias [num_nodes]
    w1 = jax.random.normal(kw1, (num_nodes, d), dtype=jnp.float32) * 0.1
    b1 = jax.random.normal(kb1, (num_nodes,), dtype=jnp.float32) * 0.1

    # lin2: nn.Linear(num_nodes, 1, bias=False), simplex-projected as in __init__
    w2 = jax.random.normal(kw2, (1, num_nodes), dtype=jnp.float32) * 0.1
    w2 = project_simplex(w2)
    # TODO(synk): broadcast() (torch.distributed param sync) has no single-device Pallas equivalent; init is already deterministic.

    # Plain-JAX reference (same math as the PyTorch forward).
    ref = jax.nn.sigmoid(x @ w1.T + b1) @ w2.T

    # f32 MXU operands: strict check against the reference.
    out_f32 = committor_net(x, w1, b1, w2, mxu_dtype=jnp.float32)
    jax.block_until_ready(out_f32)
    assert out_f32.shape == (B, 1)
    assert jnp.allclose(out_f32, ref, atol=1e-5, rtol=1e-5), "f32 mismatch vs reference"

    # bf16 MXU operands (default fast path on v5e/v6e/v7x): relaxed tolerance.
    out_bf16 = committor_net(x, w1, b1, w2)
    jax.block_until_ready(out_bf16)
    assert out_bf16.shape == (B, 1)
    assert jnp.allclose(out_bf16, ref, atol=2e-2, rtol=2e-2), "bf16 mismatch vs reference"

    print("KERNEL_OK")
</pallas_src>

<mosaic_0001>
module attributes {stable_mosaic.version = 11 : i64} {
  func.func @committor_kernel(%arg0: i32, %arg1: memref<16x16xf32, #tpu.memory_space<vmem>>, %arg2: memref<16x128xf32, #tpu.memory_space<vmem>>, %arg3: memref<1x128xf32, #tpu.memory_space<vmem>>, %arg4: memref<1x128xf32, #tpu.memory_space<vmem>>, %arg5: memref<1x16xf32, #tpu.memory_space<vmem>>) attributes {dimension_semantics = [#tpu.dimension_semantics<parallel>], iteration_bounds = array<i64: 1>, scalar_prefetch = 0 : i64, scratch_operands = 0 : i64, tpu.core_type = #tpu.core_type<tc>, window_params = [{transform_indices = @transform_0, window_bounds = array<i64: 16, 16>}, {pipeline_mode = #tpu.pipeline_mode<synchronous>, transform_indices = @transform_1, window_bounds = array<i64: 16, 128>}, {pipeline_mode = #tpu.pipeline_mode<synchronous>, transform_indices = @transform_2, window_bounds = array<i64: 1, 128>}, {pipeline_mode = #tpu.pipeline_mode<synchronous>, transform_indices = @transform_3, window_bounds = array<i64: 1, 128>}, {transform_indices = @transform_4, window_bounds = array<i64: 1, 16>}]} {
    %c0 = arith.constant 0 : index
    %c0_0 = arith.constant 0 : index
    %0 = vector.load %arg1[%c0, %c0_0] : memref<16x16xf32, #tpu.memory_space<vmem>>, vector<16x16xf32>
    %c0_1 = arith.constant 0 : index
    %c0_2 = arith.constant 0 : index
    %1 = vector.load %arg2[%c0_1, %c0_2] : memref<16x128xf32, #tpu.memory_space<vmem>>, vector<16x128xf32>
    %cst = arith.constant dense<0.000000e+00> : vector<16x128xf32>
    %2 = tpu.matmul %0, %1, %cst {dimension_numbers = #tpu.dot_dimension_numbers<[1], [0], [0], [1], [0, 0, 1, 1], [], []>} : vector<16x16xf32>, vector<16x128xf32>, vector<16x128xf32> -> vector<16x128xf32>
    %c0_3 = arith.constant 0 : index
    %c0_4 = arith.constant 0 : index
    %3 = vector.load %arg3[%c0_3, %c0_4] : memref<1x128xf32, #tpu.memory_space<vmem>>, vector<1x128xf32>
    %4 = vector.broadcast %3 : vector<1x128xf32> to vector<16x128xf32>
    %5 = arith.addf %2, %4 : vector<16x128xf32>
    %6 = arith.negf %5 : vector<16x128xf32>
    %7 = math.exp %6 : vector<16x128xf32>
    %cst_5 = arith.constant 1.000000e+00 : f32
    %8 = vector.broadcast %cst_5 : f32 to vector<16x128xf32>
    %9 = arith.addf %8, %7 : vector<16x128xf32>
    %10 = arith.divf %8, %9 : vector<16x128xf32>
    %c0_6 = arith.constant 0 : index
    %c0_7 = arith.constant 0 : index
    %11 = vector.load %arg4[%c0_6, %c0_7] : memref<1x128xf32, #tpu.memory_space<vmem>>, vector<1x128xf32>
    %12 = vector.broadcast %11 : vector<1x128xf32> to vector<16x128xf32>
    %13 = arith.mulf %10, %12 : vector<16x128xf32>
    %cst_8 = arith.constant dense<0.000000e+00> : vector<16xf32>
    %14 = vector.multi_reduction <add>, %13, %cst_8 [1] : vector<16x128xf32> to vector<16xf32>
    %15 = vector.shape_cast %14 : vector<16xf32> to vector<1x16xf32>
    %c0_9 = arith.constant 0 : index
    %c0_10 = arith.constant 0 : index
    %16 = vector.load %arg5[%c0_9, %c0_10] : memref<1x16xf32, #tpu.memory_space<vmem>>, vector<1x16xf32>
    tpu.vector_store %arg5[%c0_9, %c0_10], %15 {strides = array<i32>} : memref<1x16xf32, #tpu.memory_space<vmem>>, vector<1x16xf32>,
    return
  }
  func.func @transform_0(%arg0: i32) -> (i32, i32) {
    %c0_i32 = arith.constant 0 : i32
    %c0_i32_0 = arith.constant 0 : i32
    return %arg0, %c0_i32 : i32, i32
  }
  func.func @transform_1(%arg0: i32) -> (i32, i32) {
    %c0_i32 = arith.constant 0 : i32
    %c0_i32_0 = arith.constant 0 : i32
    %c0_i32_1 = arith.constant 0 : i32
    return %c0_i32, %c0_i32_0 : i32, i32
  }
  func.func @transform_2(%arg0: i32) -> (i32, i32) {
    %c0_i32 = arith.constant 0 : i32
    %c0_i32_0 = arith.constant 0 : i32
    %c0_i32_1 = arith.constant 0 : i32
    return %c0_i32, %c0_i32_0 : i32, i32
  }
  func.func @transform_3(%arg0: i32) -> (i32, i32) {
    %c0_i32 = arith.constant 0 : i32
    %c0_i32_0 = arith.constant 0 : i32
    %c0_i32_1 = arith.constant 0 : i32
    return %c0_i32, %c0_i32_0 : i32, i32
  }
  func.func @transform_4(%arg0: i32) -> (i32, i32) {
    %c0_i32 = arith.constant 0 : i32
    %c0_i32_0 = arith.constant 0 : i32
    return %c0_i32, %arg0 : i32, i32
  }
}

</mosaic_0001>

<bundles_post_ra>
// kernel: committor_net.1
= control target key start
LH: loop header
LB: loop body
LE: loop exit
PB: predicated region body
PF: predicated region fallthrough
CT: control target
= control target key end

     0   :  { %vm28_vm0 = vcmask 130048   ;;  %v137_v20 = vlaneseq  ;;  %vm148_vm1 = vcmask 130112   ;;  %vm151_vm2 = vcmask 122880   ;;  %s228_s1 = inlined_call_operand.vmem [shape: f32[16,128], index: 1, kind: input, shape index: {}]   ;;  %s229_s0 = inlined_call_operand.vmem [shape: f32[16,16], index: 0, kind: input, shape index: {}]   ;;  %s230_s2 = inlined_call_operand.vmem [shape: f32[1,128], index: 2, kind: input, shape index: {}]   ;;  %s231_s3 = inlined_call_operand.vmem [shape: f32[1,128], index: 3, kind: input, shape index: {}]   ;;  %s232_s4 = inlined_call_operand.vmem [shape: f32[1,16], index: 4, kind: output, shape index: {}]  }
   0x1   :  { %v20_v0 = vld [vmem:[%s228_s1 + $0x8] sm:$0xff]  ;;  %v19_v1 = vld [vmem:[%s228_s1] sm:$0xff] }
   0x2   :  { %v17_v2 = vld [vmem:[%s229_s0] sm:$0xff]  ;;  %167 = vmatprep.subr.mxu0 %v20_v0  ;;  %v18_v3 = vld [vmem:[%s229_s0 + $0x8] sm:$0xff]  ;;  %v138_v21 = vand.u32 127, %v137_v20  ;;  %v140_v22 = vshrl.u32 %v137_v20, 7 }
   0x3   :  { %171 = vmatprep.mubr.msk.f32.mxu0 %vm28_vm0, %v17_v2  ;;  %168 = vmatpush3.msra.mxu0 %v20_v0  ;;  %v157_v4 = vld [vmem:[%s230_s2] ss:$0 sm:$0xff] }
   0x4   :  { %169 = vmatprep.subr.mxu0 %v19_v1  ;;  %v162_v16 = vld [vmem:[%s231_s3] ss:$0 sm:$0xff]  ;;  %v143_v23 = vadd.s32 4294967288, %v138_v21  ;;  %v141_v25 = vsub.s32 %v138_v21, %v140_v22 }
   0x5   :  { %170 = vmatpush3.msra.mxu0 %v19_v1 }
   0x6   :  { %172 = vmatmul.mubr.msk.f32.vlgmr.msra.gmra.mxu0 %vm28_vm0, %v18_v3  ;;  %v146_v26 = vsub.s32 %v143_v23, %v140_v22 }
  0xc6   :  { %v173_v5 = vpop.f32.mrf.mxu0 }
  0xc7   :  { %v107_v6 = vadd.f32 %v173_v5, %v157_v4 }
  0xc8   :  { %v101_v7 = vpop.f32.mrf.mxu0 }
  0xc9   :  { %v161_v8 = vmul.f32 -1.442695, %v107_v6  ;;  %v102_v9 = vadd.f32 %v157_v4, %v101_v7 }
  0xcb   :  { %174 = vpow2.f32 %v161_v8  ;;  %v160_v10 = vmul.f32 -1.442695, %v102_v9 }
  0xcd   :  { %176 = vpow2.f32 %v160_v10 }
  0xd8   :  { %v175_v11 = vpop.eup %174 }
  0xd9   :  { %v117_v13 = vadd.f32 1.0, %v175_v11 }
  0xda   :  { %v177_v12 = vpop.eup %176 }
  0xdb   :  { %v116_v14 = vadd.f32 1.0, %v177_v12 }
  0xdd   :  { %178 = vrcp.f32 %v116_v14 }
  0xde   :  { %180 = vrcp.f32 %v117_v13 }
  0xea   :  { %v179_v15 = vpop.eup %178 }
  0xeb   :  { %v129_v17 = vmul.f32 %v179_v15, %v162_v16  ;;  %v181_v18 = vpop.eup %180 }
  0xec   :  { %v130_v19 = vmul.f32 %v181_v18, %v162_v16 }
  0xed   :  { %131 = vadd.xlane.f32.xlu0 %v129_v17 }
  0xf1   :  { %133 = vadd.xlane.f32.xlu0 %v130_v19 }
 0x176   :  { %v132_v24 = vpop.xlane.xlu0 %131 }
 0x177   :  { %v142_v28 = vrot.slane %v132_v24, %v141_v25 }
 0x17a   :  { %v134_v27 = vpop.xlane.xlu0 %133 }
 0x17b   :  { %v147_v29 = vrot.slane %v134_v27, %v146_v26 }
 0x17d   :  { %v149_v30 = vsel %vm148_vm1, %v147_v29, %v142_v28 }
 0x17e   :  { %152 = vst.msk [vmem:[%s232_s4] sm:$0x1] %vm151_vm2, %v149_v30 }

</bundles_post_ra>
